<compile_context>
chip_gen: v7x
topology: tpu7x:2x2x1
jax: 0.10.0
libtpu: 0.0.40
codegen_flags: <defaults>
</compile_context>

<pallas_src>
import jax
import jax.numpy as jnp
from jax.experimental import pallas as pl
from jax.experimental.pallas import tpu as pltpu


def sampling_generator(N, reverse=False):
    samplings = [False, True] * (N // 2)
    if N == 1:
        samplings = [False]
    if reverse:
        return list(reversed(samplings[:N]))
    return samplings[:N]


# ----------------------------------------------------------------------------
# Geometry shared by packing + forward
# ----------------------------------------------------------------------------
def _encoder_geometry(C_in, C_hid, H, W, K, G=2):
    assert C_hid % G == 0, "GroupNorm requires C_hid % num_groups == 0"
    p1 = K // 2                         # stride-1 'same' padding
    Hq, Wq = H + 2 * p1, W + 2 * p1
    Ho1, Wo1 = Hq - K + 1, Wq - K + 1   # == H, W for odd K
    L1 = Wo1 * C_hid                    # lane width of enc1 (128 in the test)
    p2 = (K - 1) // 2                   # stride-2 padding: (K - 2 + 1)//2
    Ho2 = (H + 2 * p2 - K) // 2 + 1
    Wo2 = (W + 2 * p2 - K) // 2 + 1
    L2 = Wo2 * C_hid                    # real latent lanes (64 in the test)
    NP = max(128, ((L2 + 127) // 128) * 128)   # lane-dense padded width
    return dict(K=K, G=G, C_in=C_in, C=C_hid, H=H, W=W, p1=p1, p2=p2,
                Hq=Hq, Wq=Wq, Ho1=Ho1, Wo1=Wo1, L1=L1,
                Ho2=Ho2, Wo2=Wo2, L2=L2, NP=NP,
                inv_n1=1.0 / float(Ho1 * Wo1 * (C_hid // G)),
                inv_n2=1.0 / float(Ho2 * Wo2 * (C_hid // G)))


# ----------------------------------------------------------------------------
# In-kernel GroupNorm(G) + SiLU epilogue on lane-dense (rows, lanes) data.
# gmask is a (G, lanes) 0/1 map (zero on padded lanes), inv_n = 1/(Ho*Wo*Cg).
# ----------------------------------------------------------------------------
def _gn_silu(y, gamma, beta, gmask, inv_n, eps=1e-5):
    col_sum = jnp.sum(y, axis=0, keepdims=True)                     # (1, L)
    mu = jnp.sum(gmask * col_sum, axis=1, keepdims=True) * inv_n    # (G, 1)
    mean_map = jnp.sum(gmask * mu, axis=0, keepdims=True)           # (1, L)
    d = y - mean_map
    col_ss = jnp.sum(d * d, axis=0, keepdims=True)                  # (1, L)
    var = jnp.sum(gmask * col_ss, axis=1, keepdims=True) * inv_n    # (G, 1)
    rstd_map = jnp.sum(gmask * jax.lax.rsqrt(var + eps), axis=0,
                       keepdims=True)                               # (1, L)
    yn = d * rstd_map * gamma + beta
    return yn * jax.nn.sigmoid(yn)                                  # SiLU


# ----------------------------------------------------------------------------
# Fused 2-layer ConvSC kernel (one batch element per grid step)
# ----------------------------------------------------------------------------
def _make_fused_kernel(K, G, inv_n1, inv_n2):
    def kernel(x1_ref, w1_ref, w2_ref, s2_ref, prm1_ref, prm2_ref,
               enc1_ref, lat_ref):
        # x1_ref  : (1, Ho1, K*Wq*Cin) bf16  layer-1 H-im2col rows
        # w1_ref  : (K*Wq*Cin, L1)     bf16  layer-1 Toeplitz weight
        # w2_ref  : (L1, K*NP)         bf16  layer-2 stride-2 W-Toeplitz, per-tap
        # s2_ref  : (K, Ho2, Ho1)      f32   layer-2 H-stride selection matrices
        # prm*    : (3+G, lanes)       f32   rows = bias, gamma, beta, gmask[G]
        # enc1_ref: (1, Ho1, L1)       bf16
        # lat_ref : (1, Ho2, NP)       bf16
        NP = lat_ref.shape[2]

        # ---------------- layer 1 (stride 1): single matmul -----------------
        prm1 = prm1_ref[...]
        y1 = jnp.dot(x1_ref[0], w1_ref[...],
                     preferred_element_type=jnp.float32)       # (Ho1, L1) f32
        y1 = y1 + prm1[0:1, :]
        a1 = _gn_silu(y1, prm1[1:2, :], prm1[2:3, :], prm1[3:3 + G, :], inv_n1)
        enc1_ref[0] = a1.astype(enc1_ref.dtype)

        # ---------------- layer 2 (stride 2) --------------------------------
        # W-stride handled inside w2 (Toeplitz); H-stride handled by the tiny
        # selection matmuls S_kh @ F_kh -- no strided / offset VMEM access.
        prm2 = prm2_ref[...]
        f2 = jnp.dot(a1.astype(jnp.bfloat16), w2_ref[...],
                     preferred_element_type=jnp.float32)       # (Ho1, K*NP)
        acc2 = jnp.dot(s2_ref[0], f2[:, 0:NP],
                       preferred_element_type=jnp.float32)     # (Ho2, NP)
        for kh in range(1, K):
            acc2 = acc2 + jnp.dot(s2_ref[kh], f2[:, kh * NP:(kh + 1) * NP],
                                  preferred_element_type=jnp.float32)
        y2 = acc2 + prm2[0:1, :]
        a2 = _gn_silu(y2, prm2[1:2, :], prm2[2:3, :], prm2[3:3 + G, :], inv_n2)
        lat_ref[0] = a2.astype(lat_ref.dtype)
    return kernel


# ----------------------------------------------------------------------------
# Init-time packing of parameters into kernel-ready operands
# ----------------------------------------------------------------------------
def _pack_affine(bias, gamma, beta, Wo, C, G, L_pad):
    L = Wo * C
    def tile_pad(v):
        return jnp.pad(jnp.tile(v.astype(jnp.float32), Wo), (0, L_pad - L))
    lane = jnp.arange(L_pad)
    gmask = (((lane[None, :] % C) // (C // G)) == jnp.arange(G)[:, None]) \
        & (lane[None, :] < L)
    return jnp.concatenate(
        [tile_pad(bias)[None, :], tile_pad(gamma)[None, :],
         tile_pad(beta)[None, :], gmask.astype(jnp.float32)], axis=0)


def pack_encoder_params(weights, H, W, num_groups=2):
    """Pack the two ConvSC layers (stride 1, stride 2) for the fused kernel."""
    (w1, b1, g1, be1), (w2, b2, g2, be2) = weights
    K, _, C_in, C = w1.shape
    geo = _encoder_geometry(C_in, C, H, W, K, num_groups)
    Wq, Wo1, Ho1 = geo["Wq"], geo["Wo1"], geo["Ho1"]
    Wo2, Ho2, L1, L2, NP, p2 = (geo["Wo2"], geo["Ho2"], geo["L1"],
                                geo["L2"], geo["NP"], geo["p2"])
    G = num_groups

    # Layer 1: block-Toeplitz weight with the H-im2col fold: (K*Wq*Cin, L1)
    # w1_cat[kh*Wq*Cin + wq*Cin + ci, j*C + co] = w1[kh, wq - j, ci, co]
    sel1 = (jnp.arange(Wq)[:, None, None]
            == jnp.arange(Wo1)[None, :, None] + jnp.arange(K)[None, None, :])
    w1_toe = jnp.einsum("wjb,abio->awijo", sel1.astype(w1.dtype), w1)
    w1_cat = w1_toe.reshape(K * Wq * C_in, L1).astype(jnp.bfloat16)

    # Layer 2: stride-2 W-Toeplitz from UNPADDED enc1 lanes, lane-padded to NP,
    # K taps concatenated along lanes -> (L1, K*NP)
    sel2 = (jnp.arange(Wo1)[:, None, None]
            == 2 * jnp.arange(Wo2)[None, :, None]
            + jnp.arange(K)[None, None, :] - p2)
    w2_toe = jnp.einsum("wjb,abio->awijo", sel2.astype(w2.dtype), w2)
    w2_toe = w2_toe.reshape(K, L1, L2)
    w2_toe = jnp.pad(w2_toe, ((0, 0), (0, 0), (0, NP - L2)))
    w2_cat = jnp.transpose(w2_toe, (1, 0, 2)).reshape(L1, K * NP)
    w2_cat = w2_cat.astype(jnp.bfloat16)

    # Layer 2: H-stride selection matrices s2[kh, h2, r] = (r == 2*h2 + kh - p2)
    s2 = (jnp.arange(Ho1)[None, None, :]
          == 2 * jnp.arange(Ho2)[None, :, None]
          + jnp.arange(K)[:, None, None] - p2).astype(jnp.float32)

    prm1 = _pack_affine(b1, g1, be1, Wo1, C, G, L1)   # (3+G, L1)
    prm2 = _pack_affine(b2, g2, be2, Wo2, C, G, NP)   # (3+G, NP)
    return {"w1": w1_cat, "w2": w2_cat, "s2": s2, "prm1": prm1, "prm2": prm2}


# ----------------------------------------------------------------------------
# Forward wrapper
# ----------------------------------------------------------------------------
def make_encoder_fn(C_in, C_hid, H, W, spatio_kernel=3, num_groups=2):
    geo = _encoder_geometry(C_in, C_hid, H, W, spatio_kernel, num_groups)
    K, G = geo["K"], geo["G"]
    p1, Hq, Wq = geo["p1"], geo["Hq"], geo["Wq"]
    Ho1, L1 = geo["Ho1"], geo["L1"]
    Ho2, Wo2, L2, NP = geo["Ho2"], geo["Wo2"], geo["L2"], geo["NP"]
    kernel = _make_fused_kernel(K, G, geo["inv_n1"], geo["inv_n2"])

    @jax.jit
    def fwd(x_nhwc, packed):
        B = x_nhwc.shape[0]
        # Layer-1 input prep (tiny XLA pass): pad, lane-flatten, fold H-im2col.
        xp = jnp.pad(x_nhwc, ((0, 0), (p1, p1), (p1, p1), (0, 0)))
        rows = xp.reshape(B, Hq, Wq * C_in)
        x1 = jnp.concatenate([rows[:, kh:kh + Ho1, :] for kh in range(K)],
                             axis=-1).astype(jnp.bfloat16)   # (B, Ho1, K*Wq*Cin)

        enc1_ld, lat_ld = pl.pallas_call(
            kernel,
            out_shape=(jax.ShapeDtypeStruct((B, Ho1, L1), jnp.bfloat16),
                       jax.ShapeDtypeStruct((B, Ho2, NP), jnp.bfloat16)),
            grid=(B,),
            in_specs=[
                pl.BlockSpec((1, Ho1, K * Wq * C_in), lambda b: (b, 0, 0)),
                pl.BlockSpec((K * Wq * C_in, L1), lambda b: (0, 0)),
                pl.BlockSpec((L1, K * NP), lambda b: (0, 0)),
                pl.BlockSpec((K, Ho2, Ho1), lambda b: (0, 0, 0)),
                pl.BlockSpec((3 + G, L1), lambda b: (0, 0)),
                pl.BlockSpec((3 + G, NP), lambda b: (0, 0)),
            ],
            out_specs=(
                pl.BlockSpec((1, Ho1, L1), lambda b: (b, 0, 0)),
                pl.BlockSpec((1, Ho2, NP), lambda b: (b, 0, 0)),
            ),
            compiler_params=pltpu.CompilerParams(
                dimension_semantics=("parallel",)),
        )(x1, packed["w1"], packed["w2"], packed["s2"],
          packed["prm1"], packed["prm2"])

        enc1 = enc1_ld.reshape(B, Ho1, L1 // C_hid, C_hid)
        latent = lat_ld[:, :, :L2].reshape(B, Ho2, Wo2, C_hid)
        return latent, enc1

    return fwd


# ----------------------------------------------------------------------------
# Parameter init (matches PyTorch: trunc_normal_(std=0.02), bias 0, GN affine)
# ----------------------------------------------------------------------------
def init_encoder_params(key, C_in, C_hid, N_S, spatio_kernel):
    samplings = sampling_generator(N_S)
    weights, strides = [], []
    cin = C_in
    for s in samplings:
        key, wk = jax.random.split(key)
        w = jax.random.truncated_normal(
            wk, -2.0, 2.0, (spatio_kernel, spatio_kernel, cin, C_hid),
            jnp.float32) * 0.02
        weights.append((w, jnp.zeros((C_hid,), jnp.float32),
                        jnp.ones((C_hid,), jnp.float32),
                        jnp.zeros((C_hid,), jnp.float32)))
        strides.append(2 if s else 1)
        cin = C_hid
    return weights, tuple(strides)


# ----------------------------------------------------------------------------
# Pure-JAX reference (sanity check)
# ----------------------------------------------------------------------------
def _ref_convsc(x, w, b, gamma, beta, stride):
    K = w.shape[0]
    p = (K - stride + 1) // 2
    y = jax.lax.conv_general_dilated(
        x, w, window_strides=(stride, stride), padding=[(p, p), (p, p)],
        dimension_numbers=("NHWC", "HWIO", "NHWC"))
    y = y + b
    B, Ho, Wo, C = y.shape
    Cg = C // 2
    yg = y.reshape(B, Ho, Wo, 2, Cg)
    mu = yg.mean(axis=(1, 2, 4), keepdims=True)
    var = ((yg - mu) ** 2).mean(axis=(1, 2, 4), keepdims=True)
    yn = ((yg - mu) * jax.lax.rsqrt(var + 1e-5)).reshape(B, Ho, Wo, C)
    yn = yn * gamma + beta
    return yn * jax.nn.sigmoid(yn)


def _ref_encoder(x_nhwc, weights, strides):
    enc1 = _ref_convsc(x_nhwc, *weights[0], strides[0])
    latent = enc1
    for wts, s in zip(weights[1:], strides[1:]):
        latent = _ref_convsc(latent, *wts, s)
    return latent, enc1


if __name__ == "__main__":
    key = jax.random.PRNGKey(0)
    kx, kp = jax.random.split(key)

    # Encoder(C_in=4, C_hid=8, N_S=2, spatio_kernel=3), small shapes
    B, C_in, H, W = 2, 4, 16, 16
    C_hid, N_S, spatio_kernel = 8, 2, 3

    x_nchw = jax.random.normal(kx, (B, C_in, H, W), jnp.float32)  # PyTorch NCHW
    x = jnp.transpose(x_nchw, (0, 2, 3, 1))                        # -> NHWC

    weights, strides = init_encoder_params(kp, C_in, C_hid, N_S, spatio_kernel)
    assert strides == (1, 2), strides   # TODO(synk): general N_S chains pairs
    packed = pack_encoder_params(weights, H, W)
    encoder = make_encoder_fn(C_in, C_hid, H, W, spatio_kernel)

    latent, enc1 = encoder(x, packed)
    jax.block_until_ready((latent, enc1))

    # sanity check against plain-JAX reference (bf16 matmul + bf16 outputs)
    lat_ref, enc1_ref = _ref_encoder(x, weights, strides)
    assert latent.shape == (B, H // 2, W // 2, C_hid), latent.shape
    assert enc1.shape == (B, H, W, C_hid), enc1.shape
    e1 = enc1.astype(jnp.float32)
    lt = latent.astype(jnp.float32)
    assert jnp.allclose(e1, enc1_ref, atol=3e-2, rtol=3e-2), \
        float(jnp.max(jnp.abs(e1 - enc1_ref)))
    assert jnp.allclose(lt, lat_ref, atol=3e-2, rtol=3e-2), \
        float(jnp.max(jnp.abs(lt - lat_ref)))

    print("KERNEL_OK")
</pallas_src>

<mosaic_0001>
module attributes {stable_mosaic.version = 11 : i64} {
  func.func @kernel(%arg0: i32, %arg1: memref<1x16x216xbf16, #tpu.memory_space<vmem>>, %arg2: memref<216x128xbf16, #tpu.memory_space<vmem>>, %arg3: memref<128x384xbf16, #tpu.memory_space<vmem>>, %arg4: memref<3x8x16xf32, #tpu.memory_space<vmem>>, %arg5: memref<5x128xf32, #tpu.memory_space<vmem>>, %arg6: memref<5x128xf32, #tpu.memory_space<vmem>>, %arg7: memref<1x16x128xbf16, #tpu.memory_space<vmem>>, %arg8: memref<1x8x128xbf16, #tpu.memory_space<vmem>>) attributes {dimension_semantics = [#tpu.dimension_semantics<parallel>], iteration_bounds = array<i64: 2>, scalar_prefetch = 0 : i64, scratch_operands = 0 : i64, tpu.core_type = #tpu.core_type<tc>, window_params = [{transform_indices = @transform_0, window_bounds = array<i64: 1, 16, 216>}, {pipeline_mode = #tpu.pipeline_mode<synchronous>, transform_indices = @transform_1, window_bounds = array<i64: 216, 128>}, {pipeline_mode = #tpu.pipeline_mode<synchronous>, transform_indices = @transform_2, window_bounds = array<i64: 128, 384>}, {pipeline_mode = #tpu.pipeline_mode<synchronous>, transform_indices = @transform_3, window_bounds = array<i64: 3, 8, 16>}, {pipeline_mode = #tpu.pipeline_mode<synchronous>, transform_indices = @transform_4, window_bounds = array<i64: 5, 128>}, {pipeline_mode = #tpu.pipeline_mode<synchronous>, transform_indices = @transform_5, window_bounds = array<i64: 5, 128>}, {transform_indices = @transform_6, window_bounds = array<i64: 1, 16, 128>}, {transform_indices = @transform_7, window_bounds = array<i64: 1, 8, 128>}]} {
    %c0 = arith.constant 0 : index
    %c0_0 = arith.constant 0 : index
    %0 = vector.load %arg5[%c0, %c0_0] : memref<5x128xf32, #tpu.memory_space<vmem>>, vector<5x128xf32>
    %c0_1 = arith.constant 0 : index
    %c0_2 = arith.constant 0 : index
    %c0_3 = arith.constant 0 : index
    %1 = vector.load %arg1[%c0_1, %c0_2, %c0_3] : memref<1x16x216xbf16, #tpu.memory_space<vmem>>, vector<1x16x216xbf16>
    %2 = vector.shape_cast %1 : vector<1x16x216xbf16> to vector<16x216xbf16>
    %c0_4 = arith.constant 0 : index
    %c0_5 = arith.constant 0 : index
    %3 = vector.load %arg2[%c0_4, %c0_5] : memref<216x128xbf16, #tpu.memory_space<vmem>>, vector<216x128xbf16>
    %cst = arith.constant dense<0.000000e+00> : vector<16x128xf32>
    %4 = tpu.matmul %2, %3, %cst {dimension_numbers = #tpu.dot_dimension_numbers<[1], [0], [0], [1], [0, 0, 1, 1], [], []>} : vector<16x216xbf16>, vector<216x128xbf16>, vector<16x128xf32> -> vector<16x128xf32>
    %5 = vector.extract_strided_slice %0 {offsets = [0, 0], sizes = [1, 128], strides = [1, 1]} : vector<5x128xf32> to vector<1x128xf32>
    %6 = vector.broadcast %5 : vector<1x128xf32> to vector<16x128xf32>
    %7 = arith.addf %4, %6 : vector<16x128xf32>
    %8 = vector.extract_strided_slice %0 {offsets = [1, 0], sizes = [1, 128], strides = [1, 1]} : vector<5x128xf32> to vector<1x128xf32>
    %9 = vector.extract_strided_slice %0 {offsets = [2, 0], sizes = [1, 128], strides = [1, 1]} : vector<5x128xf32> to vector<1x128xf32>
    %10 = vector.extract_strided_slice %0 {offsets = [3, 0], sizes = [2, 128], strides = [1, 1]} : vector<5x128xf32> to vector<2x128xf32>
    %cst_6 = arith.constant dense<0.000000e+00> : vector<128xf32>
    %11 = vector.multi_reduction <add>, %7, %cst_6 [0] : vector<16x128xf32> to vector<128xf32>
    %12 = vector.shape_cast %11 : vector<128xf32> to vector<1x128xf32>
    %13 = vector.broadcast %12 : vector<1x128xf32> to vector<2x128xf32>
    %14 = arith.mulf %10, %13 : vector<2x128xf32>
    %cst_7 = arith.constant dense<0.000000e+00> : vector<2xf32>
    %15 = vector.multi_reduction <add>, %14, %cst_7 [1] : vector<2x128xf32> to vector<2xf32>
    %16 = vector.shape_cast %15 : vector<2xf32> to vector<2x1xf32>
    %cst_8 = arith.constant 9.765625E-4 : f32
    %17 = vector.broadcast %cst_8 : f32 to vector<2x1xf32>
    %18 = arith.mulf %16, %17 : vector<2x1xf32>
    %19 = vector.broadcast %18 : vector<2x1xf32> to vector<2x128xf32>
    %20 = arith.mulf %10, %19 : vector<2x128xf32>
    %cst_9 = arith.constant dense<0.000000e+00> : vector<128xf32>
    %21 = vector.multi_reduction <add>, %20, %cst_9 [0] : vector<2x128xf32> to vector<128xf32>
    %22 = vector.shape_cast %21 : vector<128xf32> to vector<1x128xf32>
    %23 = vector.broadcast %22 : vector<1x128xf32> to vector<16x128xf32>
    %24 = arith.subf %7, %23 : vector<16x128xf32>
    %25 = arith.mulf %24, %24 : vector<16x128xf32>
    %cst_10 = arith.constant dense<0.000000e+00> : vector<128xf32>
    %26 = vector.multi_reduction <add>, %25, %cst_10 [0] : vector<16x128xf32> to vector<128xf32>
    %27 = vector.shape_cast %26 : vector<128xf32> to vector<1x128xf32>
    %28 = vector.broadcast %27 : vector<1x128xf32> to vector<2x128xf32>
    %29 = arith.mulf %10, %28 : vector<2x128xf32>
    %cst_11 = arith.constant dense<0.000000e+00> : vector<2xf32>
    %30 = vector.multi_reduction <add>, %29, %cst_11 [1] : vector<2x128xf32> to vector<2xf32>
    %31 = vector.shape_cast %30 : vector<2xf32> to vector<2x1xf32>
    %cst_12 = arith.constant 9.765625E-4 : f32
    %32 = vector.broadcast %cst_12 : f32 to vector<2x1xf32>
    %33 = arith.mulf %31, %32 : vector<2x1xf32>
    %cst_13 = arith.constant 9.99999974E-6 : f32
    %34 = vector.broadcast %cst_13 : f32 to vector<2x1xf32>
    %35 = arith.addf %33, %34 : vector<2x1xf32>
    %36 = math.rsqrt %35 : vector<2x1xf32>
    %37 = vector.broadcast %36 : vector<2x1xf32> to vector<2x128xf32>
    %38 = arith.mulf %10, %37 : vector<2x128xf32>
    %cst_14 = arith.constant dense<0.000000e+00> : vector<128xf32>
    %39 = vector.multi_reduction <add>, %38, %cst_14 [0] : vector<2x128xf32> to vector<128xf32>
    %40 = vector.shape_cast %39 : vector<128xf32> to vector<1x128xf32>
    %41 = vector.broadcast %40 : vector<1x128xf32> to vector<16x128xf32>
    %42 = arith.mulf %24, %41 : vector<16x128xf32>
    %43 = vector.broadcast %8 : vector<1x128xf32> to vector<16x128xf32>
    %44 = arith.mulf %42, %43 : vector<16x128xf32>
    %45 = vector.broadcast %9 : vector<1x128xf32> to vector<16x128xf32>
    %46 = arith.addf %44, %45 : vector<16x128xf32>
    %47 = arith.negf %46 : vector<16x128xf32>
    %48 = math.exp %47 : vector<16x128xf32>
    %cst_15 = arith.constant 1.000000e+00 : f32
    %49 = vector.broadcast %cst_15 : f32 to vector<16x128xf32>
    %50 = arith.addf %49, %48 : vector<16x128xf32>
    %51 = arith.divf %49, %50 : vector<16x128xf32>
    %52 = arith.mulf %46, %51 : vector<16x128xf32>
    %53 = arith.truncf %52 : vector<16x128xf32> to vector<16x128xbf16>
    %c0_16 = arith.constant 0 : index
    %c0_17 = arith.constant 0 : index
    %c0_18 = arith.constant 0 : index
    %54 = vector.load %arg7[%c0_16, %c0_17, %c0_18] : memref<1x16x128xbf16, #tpu.memory_space<vmem>>, vector<1x16x128xbf16>
    %55 = vector.shape_cast %54 : vector<1x16x128xbf16> to vector<16x128xbf16>
    %56 = vector.shape_cast %53 : vector<16x128xbf16> to vector<1x16x128xbf16>
    tpu.vector_store %arg7[%c0_16, %c0_17, %c0_18], %56 {strides = array<i32>} : memref<1x16x128xbf16, #tpu.memory_space<vmem>>, vector<1x16x128xbf16>,
    %c0_19 = arith.constant 0 : index
    %c0_20 = arith.constant 0 : index
    %57 = vector.load %arg6[%c0_19, %c0_20] : memref<5x128xf32, #tpu.memory_space<vmem>>, vector<5x128xf32>
    %58 = arith.truncf %52 : vector<16x128xf32> to vector<16x128xbf16>
    %c0_21 = arith.constant 0 : index
    %c0_22 = arith.constant 0 : index
    %59 = vector.load %arg3[%c0_21, %c0_22] : memref<128x384xbf16, #tpu.memory_space<vmem>>, vector<128x384xbf16>
    %cst_23 = arith.constant dense<0.000000e+00> : vector<16x384xf32>
    %60 = tpu.matmul %58, %59, %cst_23 {dimension_numbers = #tpu.dot_dimension_numbers<[1], [0], [0], [1], [0, 0, 1, 1], [], []>} : vector<16x128xbf16>, vector<128x384xbf16>, vector<16x384xf32> -> vector<16x384xf32>
    %c0_24 = arith.constant 0 : index
    %c0_25 = arith.constant 0 : index
    %c0_26 = arith.constant 0 : index
    %61 = vector.load %arg4[%c0_24, %c0_25, %c0_26] : memref<3x8x16xf32, #tpu.memory_space<vmem>>, vector<1x8x16xf32>
    %62 = vector.shape_cast %61 : vector<1x8x16xf32> to vector<8x16xf32>
    %63 = vector.extract_strided_slice %60 {offsets = [0, 0], sizes = [16, 128], strides = [1, 1]} : vector<16x384xf32> to vector<16x128xf32>
    %cst_27 = arith.constant dense<0.000000e+00> : vector<8x128xf32>
    %64 = tpu.matmul %62, %63, %cst_27 {dimension_numbers = #tpu.dot_dimension_numbers<[1], [0], [0], [1], [0, 0, 1, 1], [], []>} : vector<8x16xf32>, vector<16x128xf32>, vector<8x128xf32> -> vector<8x128xf32>
    %c1 = arith.constant 1 : index
    %c0_28 = arith.constant 0 : index
    %c0_29 = arith.constant 0 : index
    %65 = vector.load %arg4[%c1, %c0_28, %c0_29] : memref<3x8x16xf32, #tpu.memory_space<vmem>>, vector<1x8x16xf32>
    %66 = vector.shape_cast %65 : vector<1x8x16xf32> to vector<8x16xf32>
    %67 = vector.extract_strided_slice %60 {offsets = [0, 128], sizes = [16, 128], strides = [1, 1]} : vector<16x384xf32> to vector<16x128xf32>
    %cst_30 = arith.constant dense<0.000000e+00> : vector<8x128xf32>
    %68 = tpu.matmul %66, %67, %cst_30 {dimension_numbers = #tpu.dot_dimension_numbers<[1], [0], [0], [1], [0, 0, 1, 1], [], []>} : vector<8x16xf32>, vector<16x128xf32>, vector<8x128xf32> -> vector<8x128xf32>
    %69 = arith.addf %64, %68 : vector<8x128xf32>
    %c2 = arith.constant 2 : index
    %c0_31 = arith.constant 0 : index
    %c0_32 = arith.constant 0 : index
    %70 = vector.load %arg4[%c2, %c0_31, %c0_32] : memref<3x8x16xf32, #tpu.memory_space<vmem>>, vector<1x8x16xf32>
    %71 = vector.shape_cast %70 : vector<1x8x16xf32> to vector<8x16xf32>
    %72 = vector.extract_strided_slice %60 {offsets = [0, 256], sizes = [16, 128], strides = [1, 1]} : vector<16x384xf32> to vector<16x128xf32>
    %cst_33 = arith.constant dense<0.000000e+00> : vector<8x128xf32>
    %73 = tpu.matmul %71, %72, %cst_33 {dimension_numbers = #tpu.dot_dimension_numbers<[1], [0], [0], [1], [0, 0, 1, 1], [], []>} : vector<8x16xf32>, vector<16x128xf32>, vector<8x128xf32> -> vector<8x128xf32>
    %74 = arith.addf %69, %73 : vector<8x128xf32>
    %75 = vector.extract_strided_slice %57 {offsets = [0, 0], sizes = [1, 128], strides = [1, 1]} : vector<5x128xf32> to vector<1x128xf32>
    %76 = vector.broadcast %75 : vector<1x128xf32> to vector<8x128xf32>
    %77 = arith.addf %74, %76 : vector<8x128xf32>
    %78 = vector.extract_strided_slice %57 {offsets = [1, 0], sizes = [1, 128], strides = [1, 1]} : vector<5x128xf32> to vector<1x128xf32>
    %79 = vector.extract_strided_slice %57 {offsets = [2, 0], sizes = [1, 128], strides = [1, 1]} : vector<5x128xf32> to vector<1x128xf32>
    %80 = vector.extract_strided_slice %57 {offsets = [3, 0], sizes = [2, 128], strides = [1, 1]} : vector<5x128xf32> to vector<2x128xf32>
    %cst_34 = arith.constant dense<0.000000e+00> : vector<128xf32>
    %81 = vector.multi_reduction <add>, %77, %cst_34 [0] : vector<8x128xf32> to vector<128xf32>
    %82 = vector.shape_cast %81 : vector<128xf32> to vector<1x128xf32>
    %83 = vector.broadcast %82 : vector<1x128xf32> to vector<2x128xf32>
    %84 = arith.mulf %80, %83 : vector<2x128xf32>
    %cst_35 = arith.constant dense<0.000000e+00> : vector<2xf32>
    %85 = vector.multi_reduction <add>, %84, %cst_35 [1] : vector<2x128xf32> to vector<2xf32>
    %86 = vector.shape_cast %85 : vector<2xf32> to vector<2x1xf32>
    %cst_36 = arith.constant 3.906250e-03 : f32
    %87 = vector.broadcast %cst_36 : f32 to vector<2x1xf32>
    %88 = arith.mulf %86, %87 : vector<2x1xf32>
    %89 = vector.broadcast %88 : vector<2x1xf32> to vector<2x128xf32>
    %90 = arith.mulf %80, %89 : vector<2x128xf32>
    %cst_37 = arith.constant dense<0.000000e+00> : vector<128xf32>
    %91 = vector.multi_reduction <add>, %90, %cst_37 [0] : vector<2x128xf32> to vector<128xf32>
    %92 = vector.shape_cast %91 : vector<128xf32> to vector<1x128xf32>
    %93 = vector.broadcast %92 : vector<1x128xf32> to vector<8x128xf32>
    %94 = arith.subf %77, %93 : vector<8x128xf32>
    %95 = arith.mulf %94, %94 : vector<8x128xf32>
    %cst_38 = arith.constant dense<0.000000e+00> : vector<128xf32>
    %96 = vector.multi_reduction <add>, %95, %cst_38 [0] : vector<8x128xf32> to vector<128xf32>
    %97 = vector.shape_cast %96 : vector<128xf32> to vector<1x128xf32>
    %98 = vector.broadcast %97 : vector<1x128xf32> to vector<2x128xf32>
    %99 = arith.mulf %80, %98 : vector<2x128xf32>
    %cst_39 = arith.constant dense<0.000000e+00> : vector<2xf32>
    %100 = vector.multi_reduction <add>, %99, %cst_39 [1] : vector<2x128xf32> to vector<2xf32>
    %101 = vector.shape_cast %100 : vector<2xf32> to vector<2x1xf32>
    %cst_40 = arith.constant 3.906250e-03 : f32
    %102 = vector.broadcast %cst_40 : f32 to vector<2x1xf32>
    %103 = arith.mulf %101, %102 : vector<2x1xf32>
    %cst_41 = arith.constant 9.99999974E-6 : f32
    %104 = vector.broadcast %cst_41 : f32 to vector<2x1xf32>
    %105 = arith.addf %103, %104 : vector<2x1xf32>
    %106 = math.rsqrt %105 : vector<2x1xf32>
    %107 = vector.broadcast %106 : vector<2x1xf32> to vector<2x128xf32>
    %108 = arith.mulf %80, %107 : vector<2x128xf32>
    %cst_42 = arith.constant dense<0.000000e+00> : vector<128xf32>
    %109 = vector.multi_reduction <add>, %108, %cst_42 [0] : vector<2x128xf32> to vector<128xf32>
    %110 = vector.shape_cast %109 : vector<128xf32> to vector<1x128xf32>
    %111 = vector.broadcast %110 : vector<1x128xf32> to vector<8x128xf32>
    %112 = arith.mulf %94, %111 : vector<8x128xf32>
    %113 = vector.broadcast %78 : vector<1x128xf32> to vector<8x128xf32>
    %114 = arith.mulf %112, %113 : vector<8x128xf32>
    %115 = vector.broadcast %79 : vector<1x128xf32> to vector<8x128xf32>
    %116 = arith.addf %114, %115 : vector<8x128xf32>
    %117 = arith.negf %116 : vector<8x128xf32>
    %118 = math.exp %117 : vector<8x128xf32>
    %cst_43 = arith.constant 1.000000e+00 : f32
    %119 = vector.broadcast %cst_43 : f32 to vector<8x128xf32>
    %120 = arith.addf %119, %118 : vector<8x128xf32>
    %121 = arith.divf %119, %120 : vector<8x128xf32>
    %122 = arith.mulf %116, %121 : vector<8x128xf32>
    %123 = arith.truncf %122 : vector<8x128xf32> to vector<8x128xbf16>
    %c0_44 = arith.constant 0 : index
    %c0_45 = arith.constant 0 : index
    %c0_46 = arith.constant 0 : index
    %124 = vector.load %arg8[%c0_44, %c0_45, %c0_46] : memref<1x8x128xbf16, #tpu.memory_space<vmem>>, vector<1x8x128xbf16>
    %125 = vector.shape_cast %124 : vector<1x8x128xbf16> to vector<8x128xbf16>
    %126 = vector.shape_cast %123 : vector<8x128xbf16> to vector<1x8x128xbf16>
    tpu.vector_store %arg8[%c0_44, %c0_45, %c0_46], %126 {strides = array<i32>} : memref<1x8x128xbf16, #tpu.memory_space<vmem>>, vector<1x8x128xbf16>,
    return
  }
  func.func @transform_0(%arg0: i32) -> (i32, i32, i32) {
    %c0_i32 = arith.constant 0 : i32
    %c0_i32_0 = arith.constant 0 : i32
    %c0_i32_1 = arith.constant 0 : i32
    return %arg0, %c0_i32, %c0_i32_0 : i32, i32, i32
  }
  func.func @transform_1(%arg0: i32) -> (i32, i32) {
    %c0_i32 = arith.constant 0 : i32
    %c0_i32_0 = arith.constant 0 : i32
    %c0_i32_1 = arith.constant 0 : i32
    return %c0_i32, %c0_i32_0 : i32, i32
  }
  func.func @transform_2(%arg0: i32) -> (i32, i32) {
    %c0_i32 = arith.constant 0 : i32
    %c0_i32_0 = arith.constant 0 : i32
    %c0_i32_1 = arith.constant 0 : i32
    return %c0_i32, %c0_i32_0 : i32, i32
  }
  func.func @transform_3(%arg0: i32) -> (i32, i32, i32) {
    %c0_i32 = arith.constant 0 : i32
    %c0_i32_0 = arith.constant 0 : i32
    %c0_i32_1 = arith.constant 0 : i32
    %c0_i32_2 = arith.constant 0 : i32
    return %c0_i32, %c0_i32_0, %c0_i32_1 : i32, i32, i32
  }
  func.func @transform_4(%arg0: i32) -> (i32, i32) {
    %c0_i32 = arith.constant 0 : i32
    %c0_i32_0 = arith.constant 0 : i32
    %c0_i32_1 = arith.constant 0 : i32
    return %c0_i32, %c0_i32_0 : i32, i32
  }
  func.func @transform_5(%arg0: i32) -> (i32, i32) {
    %c0_i32 = arith.constant 0 : i32
    %c0_i32_0 = arith.constant 0 : i32
    %c0_i32_1 = arith.constant 0 : i32
    return %c0_i32, %c0_i32_0 : i32, i32
  }
  func.func @transform_6(%arg0: i32) -> (i32, i32, i32) {
    %c0_i32 = arith.constant 0 : i32
    %c0_i32_0 = arith.constant 0 : i32
    %c0_i32_1 = arith.constant 0 : i32
    return %arg0, %c0_i32, %c0_i32_0 : i32, i32, i32
  }
  func.func @transform_7(%arg0: i32) -> (i32, i32, i32) {
    %c0_i32 = arith.constant 0 : i32
    %c0_i32_0 = arith.constant 0 : i32
    %c0_i32_1 = arith.constant 0 : i32
    return %arg0, %c0_i32, %c0_i32_0 : i32, i32, i32
  }
}

</mosaic_0001>

<bundles_post_ra>
// kernel: fwd.1
= control target key start
LH: loop header
LB: loop body
LE: loop exit
PB: predicated region body
PF: predicated region fallthrough
CT: control target
= control target key end

     0   :  { %s1455_s24 = smov 0   ;;  %s1676_s0 = inlined_call_operand.vmem [shape: bf16[2,16,216], index: 0, kind: input, shape index: {}]   ;;  %s1677_s1 = inlined_call_operand.vmem [shape: bf16[216,128], index: 1, kind: input, shape index: {}]   ;;  %s1678_s2 = inlined_call_operand.vmem [shape: bf16[128,384], index: 2, kind: input, shape index: {}]   ;;  %s1679_s3 = inlined_call_operand.vmem [shape: f32[3,8,16], index: 3, kind: input, shape index: {}]   ;;  %s1680_s4 = inlined_call_operand.vmem [shape: f32[5,128], index: 4, kind: input, shape index: {}]   ;;  %s1681_s5 = inlined_call_operand.vmem [shape: f32[5,128], index: 5, kind: input, shape index: {}]   ;;  %s1682_s6 = inlined_call_operand.vmem [shape: bf16[2,16,128], index: 6, kind: output, shape index: {0}]   ;;  %s1683_s7 = inlined_call_operand.vmem [shape: bf16[2,8,128], index: 7, kind: output, shape index: {1}]  }
   0x1 LB: > { %s1186_s25 = sadd.s32 4294967295, %s1409_s24   ;;  %p1190_p0 = scmp.ge.s32.totalorder %s1409_s24, 1  ;;  %s1409_s24 = sphi %s1455_s24, %s18_s24  }
   0x2   : > { %p240_p1 = scmp.lt.s32.totalorder %s1409_s24, 3 }
   0x4   : > { %p241_p2 = pnand %p1190_p0, %p240_p1 }
   0x5   : > { %v1338_v0 = vld [vmem:[%s1677_s1] sm:$0xff] (!%p241_p2)   ;;  %v1411_v1 = vmov (!%p241_p2), 0   ;;  %v1339_v2 = vld [vmem:[%s1677_s1 + $0x8] sm:$0xff] (!%p241_p2)   ;;  %p276_p3 = scmp.lt.s32.totalorder (!%p241_p2), %s1186_s25, 1  ;;  %v1340_v3 = vld [vmem:[%s1677_s1 + $0x10] sm:$0xff] (!%p241_p2)   ;;  %vm415_vm0 = vcmask (!%p241_p2), 719872   ;;  %v321_v18 = vlaneseq (!%p241_p2) }
   0x6   : > { %244 = sbr.rel (%p241_p2) target bundleno = 1561 (0x619), region = 44  ;;  %423 = vmatprep.subr.bf16.mxu0 (!%p241_p2), %v1411_v1  ;;  %749 = vmatprep.mubr.bf16.mxu1 (!%p241_p2), %v1411_v1  ;;  %v1341_v4 = vld [vmem:[%s1677_s1 + $0x18] sm:$0xff] (!%p241_p2)   ;;  %v1342_v5 = vld [vmem:[%s1677_s1 + $0x20] sm:$0xff] (!%p241_p2)   ;;  %v1343_v7 = vld [vmem:[%s1677_s1 + $0x28] sm:$0xff] (!%p241_p2)   ;;  %vm419_vm1 = vcmask (!%p241_p2), 1043456   ;;  %vm472_vm2 = vcmask (!%p241_p2), 1044483  }
   0x7   : > { %424 = vmatpush1.bf16.msra.mxu0 (!%p241_p2), %v1338_v0  ;;  %v1344_v8 = vld [vmem:[%s1677_s1 + $0x30] sm:$0xff] (!%p241_p2)   ;;  %v1345_v9 = vld [vmem:[%s1677_s1 + $0x38] sm:$0xff] (!%p241_p2)   ;;  %v1346_v10 = vld [vmem:[%s1677_s1 + $0x40] sm:$0xff] (!%p241_p2)   ;;  %v1515_v19 = vshrl.u32 (!%p241_p2), %v321_v18, 7  ;;  %vm481_vm3 = vcmask (!%p241_p2), 1041408   ;;  %vm1413_vm4 = vmmov (!%p241_p2), 0  }
   0x8   : > { %425 = vmatprep.subr.bf16.mxu0 (!%p241_p2), %v1411_v1  ;;  %v1347_v11 = vld [vmem:[%s1677_s1 + $0x48] sm:$0xff] (!%p241_p2)   ;;  %v1348_v12 = vld [vmem:[%s1677_s1 + $0x50] sm:$0xff] (!%p241_p2)   ;;  %v1349_v13 = vld [vmem:[%s1677_s1 + $0x58] sm:$0xff] (!%p241_p2)   ;;  %vm804_vm5 = vcmask (!%p241_p2), 130048  }
   0x9   : > { %v1350_v14 = vld [vmem:[%s1677_s1 + $0x60] sm:$0xff] (!%p241_p2)   ;;  %v1351_v15 = vld [vmem:[%s1677_s1 + $0x68] ss:$0 sps:$4 sm:$0xff] (!%p241_p2)   ;;  %v323_v20 = vsub.s32 (!%p241_p2), 0, %v1515_v19 }
   0xa   : > { %v421_v16 = vsel (!%p241_p2), %vm419_vm1, %v1351_v15, 0  ;;  %v1521_v21 = vld [vmem:[%s1680_s4] sm:$0x1f] (!%p241_p2)  ;;  %v1358_v0 = vld [vmem:[%s1678_s2 + $0x1c] ss:$12 sps:$4 sm:$0xff] (!%p241_p2)  }
   0xb   : > { %426 = vmatpush1.bf16.msra.mxu0 (!%p241_p2), %v1339_v2  ;;  %v324_v22 = vrot.slane (!%p241_p2), %v1521_v21, %v323_v20  ;;  %v1355_v62 = vld [vmem:[%s1678_s2 + $0x4] ss:$12 sps:$4 sm:$0xff] (!%p241_p2)   ;;  %v1357_v63 = vld [vmem:[%s1678_s2] ss:$12 sps:$4 sm:$0xff] (!%p241_p2)  }
   0xc   : > { %427 = vmatprep.subr.bf16.mxu0 (!%p241_p2), %v1411_v1  ;;  %717 = vmatprep.subr.bf16.mxu1 (!%p241_p2), %v1355_v62  ;;  %v1361_v2 = vld [vmem:[%s1678_s2 + $0x34] ss:$12 sps:$4 sm:$0xff] (!%p241_p2)  }
   0xd   : > { %s1685_s25 = smov (!%p276_p3, %s1186_s25), 1  ;;  %718 = vmatpush1.bf16.msra.mxu1 %v1357_v63 }
   0xe   : > { %s1249_s9 = sshll.u32 %s1685_s25, 4  ;;  %719 = vmatprep.subr.bf16.mxu1 %v1358_v0  ;;  %s1250_s29 = sshll.u32 %s1685_s25, 3 }
   0xf   : > { %428 = vmatpush1.bf16.msra.mxu0 %v1340_v3  ;;  %s1481_s14 = scalar_lea.vmem %s1676_s0, %s1249_s9  ;;  %v1363_v3 = vld [vmem:[%s1678_s2 + $0x30] ss:$12 sps:$4 sm:$0xff]   ;;  %s285_s9 = scalar_lea.vmem %s1682_s6, %s1250_s29 }
  0x10   : > { %429 = vmatprep.subr.bf16.mxu0 %v1411_v1  ;;  %v1354_v6 = vld [vmem:[%s1481_s14 + $0x4] ss:$8 sps:$4 sm:$0xff]   ;;  %v1352_v17 = vld [vmem:[%s1481_s14] ss:$8 sps:$4 sm:$0xff]   ;;  %s1195_s13 = sshll.u32 %s1685_s25, 2 }
  0x11   : > { %1212 = vmatprep.mubr.msk.bf16.mxu0 %vm415_vm0, %v1354_v6  ;;  %v1367_v6 = vld [vmem:[%s1678_s2 + $0x64] ss:$12 sps:$4 sm:$0xff]   ;;  %s289_s14 = scalar_lea.vmem %s1683_s7, %s1195_s13 }
  0x13   : > { %430 = vmatpush1.bf16.msra.mxu0 %v1341_v4  ;;  %v1364_v4 = vld [vmem:[%s1678_s2 + $0x4c] ss:$12 sps:$4 sm:$0xff]  }
  0x14   : > { %431 = vmatprep.subr.bf16.mxu0 %v1411_v1 }
  0x17   : > { %432 = vmatpush1.bf16.msra.mxu0 %v1342_v5  ;;  %v1366_v5 = vld [vmem:[%s1678_s2 + $0x48] ss:$12 sps:$4 sm:$0xff]  }
  0x18   : > { %433 = vmatprep.subr.bf16.mxu0 %v1411_v1 }
  0x1b   : > { %434 = vmatpush1.bf16.msra.mxu0 %v1343_v7  ;;  %v1369_v7 = vld [vmem:[%s1678_s2 + $0x60] ss:$12 sps:$4 sm:$0xff]  }
  0x1c   : > { %435 = vmatprep.subr.bf16.mxu0 %v1411_v1 }
  0x1f   : > { %436 = vmatpush1.bf16.msra.mxu0 %v1344_v8  ;;  %v1370_v8 = vld [vmem:[%s1678_s2 + $0x7c] ss:$12 sps:$4 sm:$0xff]  }
  0x20   : > { %437 = vmatprep.subr.bf16.mxu0 %v1411_v1 }
  0x23   : > { %438 = vmatpush1.bf16.msra.mxu0 %v1345_v9  ;;  %v1372_v9 = vld [vmem:[%s1678_s2 + $0x78] ss:$12 sps:$4 sm:$0xff]  }
  0x24   : > { %439 = vmatprep.subr.bf16.mxu0 %v1411_v1 }
  0x27   : > { %440 = vmatpush1.bf16.msra.mxu0 %v1346_v10  ;;  %v1373_v10 = vld [vmem:[%s1678_s2 + $0x94] ss:$12 sps:$4 sm:$0xff]  }
  0x28   : > { %441 = vmatprep.subr.bf16.mxu0 %v1411_v1 }
  0x2b   : > { %442 = vmatpush1.bf16.msra.mxu0 %v1347_v11  ;;  %v1375_v11 = vld [vmem:[%s1678_s2 + $0x90] ss:$12 sps:$4 sm:$0xff]  }
  0x2c   : > { %443 = vmatprep.subr.bf16.mxu0 %v1411_v1 }
  0x2f   : > { %444 = vmatpush1.bf16.msra.mxu0 %v1348_v12  ;;  %v1376_v12 = vld [vmem:[%s1678_s2 + $0xac] ss:$12 sps:$4 sm:$0xff]  }
  0x30   : > { %445 = vmatprep.subr.bf16.mxu0 %v1411_v1 }
  0x33   : > { %446 = vmatpush1.bf16.msra.mxu0 %v1349_v13  ;;  %v1378_v13 = vld [vmem:[%s1678_s2 + $0xa8] ss:$12 sps:$4 sm:$0xff]  }
  0x34   : > { %447 = vmatprep.subr.bf16.mxu0 %v1411_v1 }
  0x37   : > { %448 = vmatpush1.bf16.msra.mxu0 %v1350_v14  ;;  %v1412_v14 = vmov 0.0  }
  0x38   : > { %449 = vmatprep.subr.bf16.mxu0 %v1411_v1  ;;  %v1360_v1 = vld [vmem:[%s1678_s2 + $0x18] ss:$12 sps:$4 sm:$0xff]  }
  0x39   : > { %720 = vmatpush1.bf16.msra.mxu1 %v1360_v1 }
  0x3a   : > { %721 = vmatprep.subr.bf16.mxu1 %v1361_v2  ;;  %v1241_v2 = vld [vmem:[%s1679_s3 + $0x8] sm:$0xff] }
  0x3b   : > { %450 = vmatpush1.bf16.msra.mxu0 %v421_v16 }
  0x3d   : > { %722 = vmatpush1.bf16.msra.mxu1 %v1363_v3  ;;  %v801_v3 = vld [vmem:[%s1679_s3] sm:$0xff] }
  0x3e   : > { %456 = vmatmul.mubr.bf16.vlgmr.msra.gmra.mrb[0].mxu0 %v1352_v17  ;;  %723 = vmatprep.subr.bf16.mxu1 %v1364_v4 }
  0x3f   : > { %1300 = vmatprep.mubr.msk.f32.mxu0 %vm1413_vm4, %v1412_v14 }
  0x41   : > { %724 = vmatpush1.bf16.msra.mxu1 %v1366_v5 }
  0x42   : > { %725 = vmatprep.subr.bf16.mxu1 %v1367_v6 }
  0x45   : > { %726 = vmatpush1.bf16.msra.mxu1 %v1369_v7 }
  0x46   : > { %727 = vmatprep.subr.bf16.mxu1 %v1370_v8 }
  0x49   : > { %728 = vmatpush1.bf16.msra.mxu1 %v1372_v9  ;;  %v1244_v9 = vld [vmem:[%s1679_s3 + $0x10] sm:$0xff] }
  0x4a   : > { %729 = vmatprep.subr.bf16.mxu1 %v1373_v10 }
  0x4d   : > { %730 = vmatpush1.bf16.msra.mxu1 %v1375_v11 }
  0x4e   : > { %731 = vmatprep.subr.bf16.mxu1 %v1376_v12 }
  0x51   : > { %732 = vmatpush1.bf16.msra.mxu1 %v1378_v13 }
  0x52   : > { %1276 = vmatprep.subr.bf16.mxu1 %v1412_v14 }
 0x111   : > { %v457_v23 = vpop.f32.mrb[0].mxu0 }
 0x112   : > { %v459_v24 = vpop.f32.mrb[1].mxu0  ;;  %v458_v26 = vadd.f32 %v457_v23, %v324_v22 }
 0x113   : > { %v460_v25 = vpop.f32.mrb[2].mxu0 }
 0x114   : > { %v461_v27 = vadd.f32 %v460_v25, %v324_v22  ;;  %v462_v28 = vpop.f32.mrb[3].mxu0 }
 0x115   : > { %v522_v28 = vsub.s32 1, %v1515_v19 }
 0x116   : > { %v464_v29 = vadd.f32 %v461_v27, %v458_v26 }
 0x118   : > { %v465_v30 = vrot.slane %v464_v29, 4 }
 0x11a   : > { %v466_v31 = vadd.f32 %v465_v30, %v464_v29 }
 0x11c   : > { %v467_v32 = vrot.slane %v466_v31, 2 }
 0x11e   : > { %v468_v33 = vadd.f32 %v467_v32, %v466_v31  ;;  %v528_v31 = vsub.s32 2, %v1515_v19 }
 0x120   : > { %v469_v34 = vrot.slane %v468_v33, 1 }
 0x122   : > { %v470_v35 = vadd.f32 %v469_v34, %v468_v33  ;;  %v523_v33 = vrot.slane %v1521_v21, %v522_v28 }
 0x124   : > { %v471_v36 = vmul.f32 %v470_v35, %v1521_v21 }
 0x126   : > { %v473_v37 = vsel %vm472_vm2, %v471_v36, 0.0  ;;  %v529_v36 = vrot.slane %v1521_v21, %v528_v31 }
 0x127   : > { %474 = vadd.xlane.f32.xlu0 %v473_v37 }
 0x1b4   : > { %v475_v38 = vpop.xlane.xlu0 %474 }
 0x1b5   : > { %v476_v39 = vmul.f32 0.0009765625, %v475_v38 }
 0x1b7   : > { %v477_v40 = vmul.f32 %v476_v39, %v1521_v21 }
 0x1b9   : > { %v479_v41 = vrot.slane %v477_v40, 3 }
 0x1bb   : > { %v482_v42 = vsel %vm481_vm3, %v479_v41, 0.0 }
 0x1bc   : > { %v483_v43 = vrot.slane %v482_v42, 4 }
 0x1be   : > { %v484_v44 = vadd.f32 %v483_v43, %v482_v42 }
 0x1c0   : > { %v485_v45 = vrot.slane %v484_v44, 2 }
 0x1c2   : > { %v486_v46 = vadd.f32 %v485_v45, %v484_v44 }
 0x1c4   : > { %v487_v47 = vrot.slane %v486_v46, 1 }
 0x1c6   : > { %v488_v48 = vadd.f32 %v487_v47, %v486_v46 }
 0x1c8   : > { %v1530_v49 = vsub.f32 %v458_v26, %v488_v48  ;;  %v1532_v50 = vsub.f32 %v461_v27, %v488_v48 }
 0x1ca   : > { %v491_v51 = vmul.f32 %v1530_v49, %v1530_v49  ;;  %v492_v52 = vmul.f32 %v1532_v50, %v1532_v50 }
 0x1cc   : > { %v493_v53 = vadd.f32 %v492_v52, %v491_v51  ;;  %v1380_v52 = vld [vmem:[%s1678_s2 + $0x20] ss:$12 sps:$4 sm:$0xff]  }
 0x1ce   : > { %v494_v54 = vrot.slane %v493_v53, 4 }
 0x1d0   : > { %v495_v55 = vadd.f32 %v494_v54, %v493_v53  ;;  %v1381_v53 = vld [vmem:[%s1678_s2 + $0x38] ss:$12 sps:$4 sm:$0xff]   ;;  %v1382_v54 = vld [vmem:[%s1678_s2 + $0x50] ss:$12 sps:$4 sm:$0xff]  }
 0x1d2   : > { %v496_v56 = vrot.slane %v495_v55, 2 }
 0x1d4   : > { %v497_v57 = vadd.f32 %v496_v56, %v495_v55  ;;  %v1383_v55 = vld [vmem:[%s1678_s2 + $0x68] ss:$12 sps:$4 sm:$0xff]   ;;  %v1384_v56 = vld [vmem:[%s1678_s2 + $0x80] ss:$12 sps:$4 sm:$0xff]  }
 0x1d6   : > { %v498_v58 = vrot.slane %v497_v57, 1 }
 0x1d8   : > { %v499_v59 = vadd.f32 %v498_v58, %v497_v57  ;;  %v1385_v57 = vld [vmem:[%s1678_s2 + $0x98] ss:$12 sps:$4 sm:$0xff]   ;;  %v1386_v58 = vld [vmem:[%s1678_s2 + $0xb0] ss:$12 sps:$4 sm:$0xff]  }
 0x1da   : > { %v500_v60 = vmul.f32 %v499_v59, %v1521_v21  ;;  %v1414_v59 = vmov 0.0|0.0  }
 0x1db   : > { %1317 = vmatprep.subr.bf16.mxu0 %v1414_v59 }
 0x1dc   : > { %v501_v61 = vsel %vm472_vm2, %v500_v60, 0.0 }
 0x1dd   : > { %502 = vadd.xlane.f32.xlu0 %v501_v61 }
 0x26a   : > { %v503_v15 = vpop.xlane.xlu0 %502 }
 0x26b   : > { %v504_v16 = vmul.f32 0.0009765625, %v503_v15 }
 0x26d   : > { %v505_v17 = vadd.f32 1e-05, %v504_v16 }
 0x26f   : > { %1387 = vrsqrt.f32 %v505_v17 }
 0x279   : > { %v1388_v18 = vpop.eup %1387 }
 0x27a   : > { %v507_v22 = vmul.f32 %v1388_v18, %v1521_v21 }
 0x27c   : > { %v509_v23 = vrot.slane %v507_v22, 3 }
 0x27e   : > { %v511_v24 = vsel %vm481_vm3, %v509_v23, 0.0 }
 0x27f   : > { %v512_v25 = vrot.slane %v511_v24, 4 }
 0x281   : > { %v513_v26 = vadd.f32 %v512_v25, %v511_v24 }
 0x283   : > { %v514_v27 = vrot.slane %v513_v26, 2 }
 0x285   : > { %v515_v29 = vadd.f32 %v514_v27, %v513_v26 }
 0x287   : > { %v516_v30 = vrot.slane %v515_v29, 1 }
 0x289   : > { %v517_v32 = vadd.f32 %v516_v30, %v515_v29 }
 0x28b   : > { %v518_v34 = vmul.f32 %v517_v32, %v1530_v49  ;;  %v519_v35 = vmul.f32 %v517_v32, %v1532_v50  ;;  %v1379_v50 = vld [vmem:[%s1678_s2 + $0x8] ss:$12 sps:$4 sm:$0xff]  }
 0x28d   : > { %v524_v37 = vmul.f32 %v523_v33, %v518_v34  ;;  %v525_v38 = vmul.f32 %v523_v33, %v519_v35 }
 0x28f   : > { %v530_v39 = vadd.f32 %v529_v36, %v524_v37  ;;  %v531_v40 = vadd.f32 %v529_v36, %v525_v38 }
 0x291   : > { %v1213_v41 = vmul.f32 -1.442695, %v530_v39  ;;  %v1214_v42 = vmul.f32 -1.442695, %v531_v40 }
 0x293   : > { %1389 = vpow2.f32 %v1213_v41 }
 0x294   : > { %1391 = vpow2.f32 %v1214_v42 }
 0x29d   : > { %v1390_v43 = vpop.eup %1389 }
 0x29e   : > { %v1392_v44 = vpop.eup %1391  ;;  %v538_v45 = vadd.f32 1.0, %v1390_v43 }
 0x29f   : > { %v539_v46 = vadd.f32 1.0, %v1392_v44 }
 0x2a0   : > { %1393 = vrcp.f32 %v538_v45 }
 0x2a1   : > { %1395 = vrcp.f32 %v539_v46 }
 0x2aa   : > { %v1394_v47 = vpop.eup %1393 }
 0x2ab   : > { %v1396_v48 = vpop.eup %1395  ;;  %v544_v49 = vmul.f32 %v1394_v47, %v530_v39 }
 0x2ac   : > { %v545_v21 = vmul.f32 %v1396_v48, %v531_v40 }
 0x2ae   : > { %v546_v51 = vpack.c.bf16 %v545_v21, %v544_v49 }
 0x2b0   : > { %1257 = vst [vmem:[%s285_s9] sm:$0xff] %v546_v51   ;;  %750 = vmatmul.mubr.bf16.vlgmr.msra.gmra.mrb[0].mxu1 %v546_v51 }
 0x2b1   : > { %1277 = vmatpush3.bf16.msra.mxu1 %v1379_v50  ;;  %1292 = vmatprep.mubr.msk.bf16.mxu1 %vm1413_vm4, %v1412_v14 }
 0x2b2   : > { %1278 = vmatprep.subr.bf16.mxu1 %v1412_v14 }
 0x2b5   : > { %1279 = vmatpush3.bf16.msra.mxu1 %v1380_v52 }
 0x2b6   : > { %1280 = vmatprep.subr.bf16.mxu1 %v1412_v14 }
 0x2b9   : > { %1281 = vmatpush3.bf16.msra.mxu1 %v1381_v53 }
 0x2ba   : > { %1282 = vmatprep.subr.bf16.mxu1 %v1412_v14 }
 0x2bd   : > { %1283 = vmatpush3.bf16.msra.mxu1 %v1382_v54 }
 0x2be   : > { %1284 = vmatprep.subr.bf16.mxu1 %v1412_v14 }
 0x2c1   : > { %1285 = vmatpush3.bf16.msra.mxu1 %v1383_v55 }
 0x2c2   : > { %1286 = vmatprep.subr.bf16.mxu1 %v1412_v14 }
 0x2c5   : > { %1287 = vmatpush3.bf16.msra.mxu1 %v1384_v56 }
 0x2c6   : > { %1288 = vmatprep.subr.bf16.mxu1 %v1412_v14 }
 0x2c9   : > { %1289 = vmatpush3.bf16.msra.mxu1 %v1385_v57 }
 0x2ca   : > { %1290 = vmatprep.subr.bf16.mxu1 %v1412_v14 }
 0x2cd   : > { %1291 = vmatpush3.bf16.msra.mxu1 %v1386_v58 }
 0x2d0   : > { %1293 = vmatmul.mubr.bf16.vlgmr.msra.gmra.mrb[4].mxu1 %v546_v51 }
 0x383   : > { %v751_v60 = vpop.f32.mrb[0].mxu1 }
 0x384   : > { %v753_v61 = vpop.f32.mrb[1].mxu1 }
 0x385   : > { %v755_v62 = vpop.f32.mrb[2].mxu1 }
 0x386   : > { %v1321_v63 = vpack.c.bf16 %v755_v62, %v751_v60  ;;  %v757_v0 = vpop.f32.mrb[3].mxu1 }
 0x387   : > { %v1318_v1 = vpack.c.bf16 %v757_v0, %v753_v61 }
 0x389   : > { %1319 = vmatpush3.bf16.msra.mxu0 %v1318_v1 }
 0x38a   : > { %1320 = vmatprep.subr.bf16.mxu0 %v1414_v59 }
 0x38c   : > { %1301 = vmatmul.mubr.msk.f32.vlgmr.msra.gmra.mrb[4].mxu0 %vm804_vm5, %v1241_v2 }
 0x38d   : > { %1322 = vmatpush3.bf16.msra.mxu0 %v1321_v63  ;;  %1307 = vmatprep.mubr.msk.f32.mxu0 %vm1413_vm4, %v1412_v14 }
 0x38e   : > { %1323 = vmatprep.subr.bf16.mxu0 %v1414_v59 }
 0x390   : > { %1308 = vmatmul.mubr.msk.f32.vlgmr.msra.gmra.mrb[6].mxu0 %vm804_vm5, %v801_v3 }
 0x391   : > { %1314 = vmatprep.mubr.msk.f32.mxu0 %vm1413_vm4, %v1412_v14  ;;  %v556_v14 = vld [vmem:[%s1681_s5] sm:$0x1f] }
 0x392   : > { %v1030_v16 = vrot.slane %v556_v14, %v323_v20  ;;  %v1084_v1 = vrot.slane %v556_v14, %v522_v28  ;;  %v1089_v3 = vrot.slane %v556_v14, %v528_v31 }
 0x3a3   : > { %v794_v4 = vpop.f32.mrb[4].mxu1 }
 0x3a4   : > { %v1294_v5 = vpop.f32.mrb[5].mxu1 }
 0x3a5   : > { %v797_v6 = vpop.f32.mrb[6].mxu1 }
 0x3a6   : > { %v1324_v7 = vpack.c.bf16 %v797_v6, %v794_v4  ;;  %v1295_v8 = vpop.f32.mrb[7].mxu1 }
 0x3a8   : > { %1325 = vmatpush3.bf16.msra.mxu0 %v1324_v7 }
 0x3ab   : > { %1315 = vmatmul.mubr.msk.f32.vlgmr.msra.gmra.mrb[8].mxu0 %vm804_vm5, %v1244_v9 }
 0x45f   : > { %v874_v10 = vpop.f32.mrb[4].mxu0 }
 0x460   : > { %v1302_v11 = vpop.f32.mrb[5].mxu0 }
 0x463   : > { %v947_v12 = vpop.f32.mrb[6].mxu0 }
 0x464   : > { %v948_v13 = vadd.f32 %v947_v12, %v874_v10  ;;  %v1309_v15 = vpop.f32.mrb[7].mxu0 }
 0x47e   : > { %v1022_v17 = vpop.f32.mrb[8].mxu0 }
 0x47f   : > { %v1026_v18 = vadd.f32 %v1022_v17, %v948_v13  ;;  %v1316_v22 = vpop.f32.mrb[9].mxu0 }
 0x481   : > { %v1031_v23 = vadd.f32 %v1030_v16, %v1026_v18 }
 0x483   : > { %v1032_v24 = vrot.slane %v1031_v23, 4 }
 0x485   : > { %v1033_v25 = vadd.f32 %v1032_v24, %v1031_v23 }
 0x487   : > { %v1034_v26 = vrot.slane %v1033_v25, 2 }
 0x489   : > { %v1035_v27 = vadd.f32 %v1034_v26, %v1033_v25 }
 0x48b   : > { %v1036_v29 = vrot.slane %v1035_v27, 1 }
 0x48d   : > { %v1037_v30 = vadd.f32 %v1036_v29, %v1035_v27 }
 0x48f   : > { %v1038_v32 = vmul.f32 %v1037_v30, %v556_v14 }
 0x491   : > { %v1039_v33 = vsel %vm472_vm2, %v1038_v32, 0.0 }
 0x492   : > { %1040 = vadd.xlane.f32.xlu1 %v1039_v33 }
 0x51f   : > { %v1041_v34 = vpop.xlane.xlu1 %1040 }
 0x520   : > { %v1042_v35 = vmul.f32 0.00390625, %v1041_v34 }
 0x522   : > { %v1043_v36 = vmul.f32 %v1042_v35, %v556_v14 }
 0x524   : > { %v1045_v37 = vrot.slane %v1043_v36, 3 }
 0x526   : > { %v1047_v20 = vsel %vm481_vm3, %v1045_v37, 0.0 }
 0x527   : > { %v1048_v38 = vrot.slane %v1047_v20, 4 }
 0x529   : > { %v1049_v39 = vadd.f32 %v1048_v38, %v1047_v20 }
 0x52b   : > { %v1050_v40 = vrot.slane %v1049_v39, 2 }
 0x52d   : > { %v1051_v41 = vadd.f32 %v1050_v40, %v1049_v39 }
 0x52f   : > { %v1052_v42 = vrot.slane %v1051_v41, 1 }
 0x531   : > { %v1053_v43 = vadd.f32 %v1052_v42, %v1051_v41 }
 0x533   : > { %v1054_v44 = vsub.f32 %v1031_v23, %v1053_v43 }
 0x535   : > { %v1055_v45 = vmul.f32 %v1054_v44, %v1054_v44 }
 0x537   : > { %v1056_v46 = vrot.slane %v1055_v45, 4 }
 0x539   : > { %v1057_v47 = vadd.f32 %v1056_v46, %v1055_v45 }
 0x53b   : > { %v1058_v48 = vrot.slane %v1057_v47, 2 }
 0x53d   : > { %v1059_v49 = vadd.f32 %v1058_v48, %v1057_v47 }
 0x53f   : > { %v1060_v21 = vrot.slane %v1059_v49, 1 }
 0x541   : > { %v1061_v50 = vadd.f32 %v1060_v21, %v1059_v49 }
 0x543   : > { %v1062_v51 = vmul.f32 %v1061_v50, %v556_v14 }
 0x545   : > { %v1063_v52 = vsel %vm472_vm2, %v1062_v51, 0.0 }
 0x546   : > { %1064 = vadd.xlane.f32.xlu1 %v1063_v52 }
 0x5d3   : > { %v1065_v53 = vpop.xlane.xlu1 %1064 }
 0x5d4   : > { %v1066_v54 = vmul.f32 0.00390625, %v1065_v53 }
 0x5d6   : > { %v1067_v55 = vadd.f32 1e-05, %v1066_v54 }
 0x5d8   : > { %1397 = vrsqrt.f32 %v1067_v55 }
 0x5e2   : > { %v1398_v56 = vpop.eup %1397 }
 0x5e3   : > { %v1069_v57 = vmul.f32 %v1398_v56, %v556_v14 }
 0x5e5   : > { %v1071_v58 = vrot.slane %v1069_v57, 3 }
 0x5e7   : > { %v1073_v59 = vsel %vm481_vm3, %v1071_v58, 0.0 }
 0x5e8   : > { %v1074_v60 = vrot.slane %v1073_v59, 4 }
 0x5ea   : > { %v1075_v61 = vadd.f32 %v1074_v60, %v1073_v59 }
 0x5ec   : > { %v1076_v62 = vrot.slane %v1075_v61, 2 }
 0x5ee   : > { %v1077_v63 = vadd.f32 %v1076_v62, %v1075_v61 }
 0x5f0   : > { %v1078_v0 = vrot.slane %v1077_v63, 1 }
 0x5f2   : > { %v1079_v2 = vadd.f32 %v1078_v0, %v1077_v63 }
 0x5f4   : > { %v1080_v4 = vmul.f32 %v1079_v2, %v1054_v44 }
 0x5f6   : > { %v1085_v5 = vmul.f32 %v1084_v1, %v1080_v4 }
 0x5f8   : > { %v1090_v6 = vadd.f32 %v1089_v3, %v1085_v5 }
 0x5fa   : > { %v1246_v7 = vmul.f32 -1.442695, %v1090_v6 }
 0x5fc   : > { %1399 = vpow2.f32 %v1246_v7 }
 0x606   : > { %v1400_v8 = vpop.eup %1399 }
 0x607   : > { %v1094_v9 = vadd.f32 1.0, %v1400_v8 }
 0x609   : > { %1401 = vrcp.f32 %v1094_v9 }
 0x613   : > { %v1402_v10 = vpop.eup %1401 }
 0x614   : > { %v1097_v11 = vmul.f32 %v1402_v10, %v1090_v6 }
 0x616   : > { %v1098_v28 = vpack.c.bf16 %v1097_v11, %v1097_v11 }
 0x618   : > { %1099 = vst [vmem:[%s289_s14] sm:$0xf] %v1098_v28 }
 0x619 PF: > { %s18_s24 = sadd.s32 1, %s1409_s24  }
 0x61a   : > { %p15_p4 = scmp.ge.s32.totalorder %s18_s24, 4  }
 0x61c   :  { %17 = sbr.rel (!%p15_p4) target bundleno = 1 (0x1), region = 88 }

</bundles_post_ra>
